<compile_context>
chip_gen: v7x
topology: tpu7x:2x2x1
jax: 0.10.0
libtpu: 0.0.40
codegen_flags: <defaults>
</compile_context>

<pallas_src>
import jax
import jax.numpy as jnp
from jax import lax
from jax.experimental import pallas as pl
from jax.experimental.pallas import tpu as pltpu


def _cw_loss_kernel(n_rows, tile_rows):
    """n_rows: true batch size (for masking + mean); tile_rows: rows per step."""

    def kernel(kappa_ref, logits_ref, target_ref, out_ref):
        step = pl.program_id(0)
        nsteps = pl.num_programs(0)

        @pl.when(step == 0)
        def _init():
            out_ref[0, 0] = jnp.float32(0.0)

        logits = logits_ref[...].astype(jnp.float32)   # (TB, C) upcast per tile
        tgt = target_ref[...]                          # (TB, 1) int32
        tb, c = logits.shape

        # One-hot membership via 2-D iota compare (TPU needs >=2D iota).
        col = lax.broadcasted_iota(jnp.int32, (tb, c), 1)
        is_tgt = col == tgt                            # (TB, C) bool

        # Correct-class logit per row; max over wrong classes.  The correct
        # slot is replaced by exactly -10000.0, matching the PyTorch reference
        # ((1 - onehot) * logits - onehot * 10000).
        correct = jnp.sum(jnp.where(is_tgt, logits, 0.0), axis=1, keepdims=True)
        max_wrong = jnp.max(jnp.where(is_tgt, jnp.float32(-10000.0), logits),
                            axis=1, keepdims=True)

        kappa = kappa_ref[0, 0]
        loss_rows = jnp.maximum(correct - max_wrong + kappa, 0.0)   # (TB, 1)

        # Mask out padded rows of a ragged last tile.
        row = lax.broadcasted_iota(jnp.int32, (tb, 1), 0)
        valid = (step * tile_rows + row) < n_rows
        loss_rows = jnp.where(valid, loss_rows, 0.0)

        out_ref[0, 0] += jnp.sum(loss_rows)

        @pl.when(step == nsteps - 1)
        def _finalize():
            out_ref[0, 0] = out_ref[0, 0] / jnp.float32(n_rows)

    return kernel


def _pick_tile_rows(B, C, itemsize):
    """Batch tile: ~2 MiB per logits buffer so double-buffering stays well under
    the scoped-VMEM limit on v5e (16 MiB) / v6e / v7x (32 MiB)."""
    target_bytes = 2 * 1024 * 1024
    tb = target_bytes // max(1, C * itemsize)
    tb = min(tb, 1024)
    tb = (tb // 32) * 32          # multiple of 32 covers f32/bf16/int8 sublane packing
    tb = max(tb, 32)
    if B <= tb:
        return B                  # single tile == full dim (always a legal block)
    return tb


def cw_loss(logits, target, kappa=0.0, *, tile_rows=None):
    """CW loss. logits: (B, C) any float dtype, target: (B,) int -> scalar f32."""
    B, C = logits.shape
    target2d = target.astype(jnp.int32).reshape(B, 1)
    kappa_arr = jnp.full((1, 1), kappa, dtype=jnp.float32)

    if tile_rows is None:
        tb = _pick_tile_rows(B, C, logits.dtype.itemsize)
    else:
        tb = min(int(tile_rows), B)

    grid = (pl.cdiv(B, tb),)

    out = pl.pallas_call(
        _cw_loss_kernel(B, tb),
        out_shape=jax.ShapeDtypeStruct((1, 1), jnp.float32),
        grid=grid,
        in_specs=[
            # kappa scalar, whole array in SMEM (reused every grid step).
            pl.BlockSpec(memory_space=pltpu.MemorySpace.SMEM),
            # logits streamed batch-tile by batch-tile in native dtype.
            pl.BlockSpec((tb, C), lambda i: (i, 0)),
            # per-row targets for the same batch tile.
            pl.BlockSpec((tb, 1), lambda i: (i, 0)),
        ],
        # (1,1) scalar accumulator, resident across the whole grid.
        out_specs=pl.BlockSpec((1, 1), lambda i: (0, 0),
                               memory_space=pltpu.MemorySpace.SMEM),
        compiler_params=pltpu.CompilerParams(
            dimension_semantics=("arbitrary",)),
    )(kappa_arr, logits, target2d)
    return out[0, 0]


def cw_loss_ref(logits, target, kappa=0.0):
    """Pure-JAX reference matching the PyTorch forward."""
    logits = logits.astype(jnp.float32)
    C = logits.shape[1]
    onehot = jax.nn.one_hot(target, C, dtype=jnp.float32)
    correct = jnp.sum(onehot * logits, axis=1)
    max_wrong = jnp.max((1.0 - onehot) * logits - onehot * 10000.0, axis=1)
    return jnp.mean(jnp.maximum(correct - max_wrong + kappa, 0.0))


if __name__ == "__main__":
    key = jax.random.PRNGKey(0)
    k1, k2, k3, k4, k5, k6 = jax.random.split(key, 6)

    # Case 1: small f32, single tile.
    B1, C1 = 8, 32
    logits1 = jax.random.normal(k1, (B1, C1), dtype=jnp.float32) * 3.0
    target1 = jax.random.randint(k2, (B1,), 0, C1, dtype=jnp.int32)
    out1 = cw_loss(logits1, target1, kappa=0.0)
    ref1 = cw_loss_ref(logits1, target1, kappa=0.0)

    # Case 2: multi-tile grid with a ragged last tile and nonzero kappa (f32).
    B2, C2 = 10, 128
    logits2 = jax.random.normal(k3, (B2, C2), dtype=jnp.float32) * 3.0
    target2 = jax.random.randint(k4, (B2,), 0, C2, dtype=jnp.int32)
    out2 = cw_loss(logits2, target2, kappa=0.5, tile_rows=8)
    ref2 = cw_loss_ref(logits2, target2, kappa=0.5)

    # Case 3: bf16 logits read in native dtype, upcast in-kernel.
    B3, C3 = 8, 128
    logits3 = (jax.random.normal(k5, (B3, C3), dtype=jnp.float32) * 3.0
               ).astype(jnp.bfloat16)
    target3 = jax.random.randint(k6, (B3,), 0, C3, dtype=jnp.int32)
    out3 = cw_loss(logits3, target3, kappa=0.25)
    ref3 = cw_loss_ref(logits3, target3, kappa=0.25)

    jax.block_until_ready((out1, out2, out3))
    assert jnp.allclose(out1, ref1, rtol=1e-5, atol=1e-5), (out1, ref1)
    assert jnp.allclose(out2, ref2, rtol=1e-5, atol=1e-5), (out2, ref2)
    assert jnp.allclose(out3, ref3, rtol=1e-2, atol=1e-2), (out3, ref3)
    print("KERNEL_OK")
</pallas_src>

<mosaic_0001>
module attributes {stable_mosaic.version = 11 : i64} {
  func.func @kernel(%arg0: i32, %arg1: memref<1x1xf32, #tpu.memory_space<smem>>, %arg2: memref<8x32xf32, #tpu.memory_space<vmem>>, %arg3: memref<8x1xi32, #tpu.memory_space<vmem>>, %arg4: memref<1x1xf32, #tpu.memory_space<smem>>) attributes {dimension_semantics = [#tpu.dimension_semantics<arbitrary>], iteration_bounds = array<i64: 1>, scalar_prefetch = 0 : i64, scratch_operands = 0 : i64, tpu.core_type = #tpu.core_type<tc>, window_params = [{transform_indices = @transform_0, window_bounds = array<i64: 1, 1>}, {transform_indices = @transform_1, window_bounds = array<i64: 8, 32>}, {transform_indices = @transform_2, window_bounds = array<i64: 8, 1>}, {transform_indices = @transform_3, window_bounds = array<i64: 1, 1>}]} {
    %c0_i32 = arith.constant 0 : i32
    %0 = arith.cmpi eq, %arg0, %c0_i32 : i32
    %1 = arith.extui %0 : i1 to i32
    %c0_i32_0 = arith.constant 0 : i32
    %2 = arith.cmpi ne, %1, %c0_i32_0 : i32
    scf.if %2 {
      %cst_19 = arith.constant 0.000000e+00 : f32
      %c0_20 = arith.constant 0 : index
      %c0_21 = arith.constant 0 : index
      %40 = memref.load %arg4[%c0_20, %c0_21] : memref<1x1xf32, #tpu.memory_space<smem>>
      memref.store %cst_19, %arg4[%c0_20, %c0_21] : memref<1x1xf32, #tpu.memory_space<smem>>
    } else {
    }
    %c0 = arith.constant 0 : index
    %c0_1 = arith.constant 0 : index
    %3 = vector.load %arg2[%c0, %c0_1] : memref<8x32xf32, #tpu.memory_space<vmem>>, vector<8x32xf32>
    %c0_2 = arith.constant 0 : index
    %c0_3 = arith.constant 0 : index
    %4 = vector.load %arg3[%c0_2, %c0_3] : memref<8x1xi32, #tpu.memory_space<vmem>>, vector<8x1xi32>
    %5 = tpu.iota {dimensions = array<i32: 1>} : vector<8x32xi32>
    %6 = vector.broadcast %4 : vector<8x1xi32> to vector<8x32xi32>
    %7 = arith.cmpi eq, %5, %6 : vector<8x32xi32>
    %cst = arith.constant 0.000000e+00 : f32
    %8 = vector.broadcast %cst : f32 to vector<8x32xf32>
    %9 = arith.select %7, %3, %8 : vector<8x32xi1>, vector<8x32xf32>
    %cst_4 = arith.constant dense<0.000000e+00> : vector<8xf32>
    %10 = vector.multi_reduction <add>, %9, %cst_4 [1] : vector<8x32xf32> to vector<8xf32>
    %11 = vector.shape_cast %10 : vector<8xf32> to vector<8x1xf32>
    %cst_5 = arith.constant -1.000000e+04 : f32
    %12 = vector.broadcast %cst_5 : f32 to vector<8x32xf32>
    %13 = arith.select %7, %12, %3 : vector<8x32xi1>, vector<8x32xf32>
    %cst_6 = arith.constant dense<0xFF800000> : vector<8xf32>
    %14 = vector.multi_reduction <maximumf>, %13, %cst_6 [1] : vector<8x32xf32> to vector<8xf32>
    %15 = vector.shape_cast %14 : vector<8xf32> to vector<8x1xf32>
    %c0_7 = arith.constant 0 : index
    %c0_8 = arith.constant 0 : index
    %16 = memref.load %arg1[%c0_7, %c0_8] : memref<1x1xf32, #tpu.memory_space<smem>>
    %17 = arith.subf %11, %15 : vector<8x1xf32>
    %18 = vector.broadcast %16 : f32 to vector<8x1xf32>
    %19 = arith.addf %17, %18 : vector<8x1xf32>
    %cst_9 = arith.constant 0.000000e+00 : f32
    %20 = vector.broadcast %cst_9 : f32 to vector<8x1xf32>
    %21 = arith.maximumf %19, %20 : vector<8x1xf32>
    %22 = tpu.iota {dimensions = array<i32: 0>} : vector<8x1xi32>
    %c8_i32 = arith.constant 8 : i32
    %23 = arith.muli %arg0, %c8_i32 : i32
    %24 = vector.broadcast %23 : i32 to vector<8x1xi32>
    %25 = arith.addi %24, %22 : vector<8x1xi32>
    %c8_i32_10 = arith.constant 8 : i32
    %26 = vector.broadcast %c8_i32_10 : i32 to vector<8x1xi32>
    %27 = arith.cmpi slt, %25, %26 : vector<8x1xi32>
    %cst_11 = arith.constant 0.000000e+00 : f32
    %28 = vector.broadcast %cst_11 : f32 to vector<8x1xf32>
    %29 = arith.select %27, %21, %28 : vector<8x1xi1>, vector<8x1xf32>
    %c0_12 = arith.constant 0 : index
    %c0_13 = arith.constant 0 : index
    %30 = memref.load %arg4[%c0_12, %c0_13] : memref<1x1xf32, #tpu.memory_space<smem>>
    %31 = vector.shape_cast %29 : vector<8x1xf32> to vector<1x8x1xf32>
    %cst_14 = arith.constant dense<0.000000e+00> : vector<1xf32>
    %32 = vector.multi_reduction <add>, %31, %cst_14 [1, 2] : vector<1x8x1xf32> to vector<1xf32>
    %33 = vector.shape_cast %32 : vector<1xf32> to vector<1x1x1xf32>
    %34 = vector.extract %33[0, 0, 0] : f32 from vector<1x1x1xf32>
    %35 = arith.addf %30, %34 : f32
    %c0_15 = arith.constant 0 : index
    %c0_16 = arith.constant 0 : index
    %36 = memref.load %arg4[%c0_15, %c0_16] : memref<1x1xf32, #tpu.memory_space<smem>>
    memref.store %35, %arg4[%c0_15, %c0_16] : memref<1x1xf32, #tpu.memory_space<smem>>
    %c0_i32_17 = arith.constant 0 : i32
    %37 = arith.cmpi eq, %arg0, %c0_i32_17 : i32
    %38 = arith.extui %37 : i1 to i32
    %c0_i32_18 = arith.constant 0 : i32
    %39 = arith.cmpi ne, %38, %c0_i32_18 : i32
    scf.if %39 {
      %c0_19 = arith.constant 0 : index
      %c0_20 = arith.constant 0 : index
      %40 = memref.load %arg4[%c0_19, %c0_20] : memref<1x1xf32, #tpu.memory_space<smem>>
      %cst_21 = arith.constant 8.000000e+00 : f32
      %41 = arith.divf %40, %cst_21 : f32
      %c0_22 = arith.constant 0 : index
      %c0_23 = arith.constant 0 : index
      %42 = memref.load %arg4[%c0_22, %c0_23] : memref<1x1xf32, #tpu.memory_space<smem>>
      memref.store %41, %arg4[%c0_22, %c0_23] : memref<1x1xf32, #tpu.memory_space<smem>>
    } else {
    }
    return
  }
  func.func @transform_0(%arg0: i32) -> (i32, i32) {
    %c0_i32 = arith.constant 0 : i32
    %c0_i32_0 = arith.constant 0 : i32
    %c0_i32_1 = arith.constant 0 : i32
    return %c0_i32, %c0_i32_0 : i32, i32
  }
  func.func @transform_1(%arg0: i32) -> (i32, i32) {
    %c0_i32 = arith.constant 0 : i32
    %c0_i32_0 = arith.constant 0 : i32
    return %arg0, %c0_i32 : i32, i32
  }
  func.func @transform_2(%arg0: i32) -> (i32, i32) {
    %c0_i32 = arith.constant 0 : i32
    %c0_i32_0 = arith.constant 0 : i32
    return %arg0, %c0_i32 : i32, i32
  }
  func.func @transform_3(%arg0: i32) -> (i32, i32) {
    %c0_i32 = arith.constant 0 : i32
    %c0_i32_0 = arith.constant 0 : i32
    %c0_i32_1 = arith.constant 0 : i32
    return %c0_i32, %c0_i32_0 : i32, i32
  }
}

</mosaic_0001>

<bundles_post_ra>
// kernel: tpu_custom_call.1
= control target key start
LH: loop header
LB: loop body
LE: loop exit
PB: predicated region body
PF: predicated region fallthrough
CT: control target
= control target key end

     0   :  { %s148_s0 = inlined_call_operand.<no memory space> [shape: f32[1,1], index: 0, kind: input, shape index: {}]   ;;  %s149_s1 = inlined_call_operand.vmem [shape: f32[8,32], index: 1, kind: input, shape index: {}]   ;;  %s150_s2 = inlined_call_operand.vmem [shape: s32[8,1], index: 2, kind: input, shape index: {}]   ;;  %s151_s3 = inlined_call_operand.hbm [shape: f32[1,1], index: 3, kind: output, shape index: {}]  }
   0x1   :  { %v23_v0 = vld [vmem:[%s150_s2] sm:$0xff] }
   0x2   :  { %9 = vsyncpa [#allocation4], 0  ;;  %v105_v1 = vmov 0   ;;  %v24_v2 = vlaneseq  ;;  %v22_v4 = vld [vmem:[%s149_s1] sm:$0xff]  ;;  %vm31_vm0 = vcmask 261120   ;;  %v41_v11 = vstv %s148_s0  ;;  %s93_s19 = scalar_lea.hbm %s151_s3, 16 }
   0x3   :  { %92 = vset.pattern.permute.xlu0 %v105_v1  ;;  %vm52_vm2 = vcmask 7168   ;;  %p94_p0 = scmp.ne.s32.totalorder %s151_s3, %s93_s19  ;;  %p97_p1 = scmp.lt.u32.totalorder %s93_s19, %s151_s3 }
   0x4   :  { %27 = vperm.xlu0 %92, %v23_v0   ;;  %v25_v3 = vand.u32 127, %v24_v2 }
   0x5   :  { %p99_p2 = pnand %p97_p1, %p94_p0 }
  0x83   :  { %v28_v5 = vpop.permute.xlu0 %27 }
  0x84   :  { %vm29_vm1 = vcmp.eq.s32.totalorder %v25_v3, %v28_v5 }
  0x85   :  { %v35_v6 = vsel %vm29_vm1, -10000.0, %v22_v4  ;;  %v30_v7 = vsel %vm29_vm1, %v22_v4, 0.0 }
  0x86   :  { %v36_v8 = vsel %vm31_vm0, %v35_v6, -inf  ;;  %v32_v9 = vsel %vm31_vm0, %v30_v7, 0.0 }
  0x87   :  { %37 = vmax.xlane.f32.xlu1 %v36_v8  ;;  %33 = vadd.xlane.f32.xlu0 %v32_v9 }
 0x114   :  { %v38_v10 = vpop.xlane.xlu1 %37  ;;  %v34_v12 = vpop.xlane.xlu0 %33 }
 0x115   :  { %v40_v13 = vsub.f32 %v34_v12, %v38_v10 }
 0x117   :  { %v42_v14 = vadd.f32 %v41_v11, %v40_v13 }
 0x119   :  { %v43_v15 = vmax.f32 %v42_v14, 0.0 }
 0x11b   :  { %v53_v16 = vsel %vm52_vm2, %v43_v15, 0.0 }
 0x11c   :  { %54 = vadd.xlane.f32.xlu1 %v53_v16 }
 0x1a9   :  { %v55_v17 = vpop.xlane.xlu1 %54 }
 0x1aa   :  { %v56_v18 = vrot.slane %v55_v17, 4 }
 0x1ac   :  { %v57_v19 = vadd.f32 %v56_v18, %v55_v17 }
 0x1ae   :  { %v58_v20 = vrot.slane %v57_v19, 2 }
 0x1b0   :  { %v59_v21 = vadd.f32 %v58_v20, %v57_v19 }
 0x1b2   :  { %v60_v22 = vrot.slane %v59_v21, 1 }
 0x1b4   :  { %v61_v23 = vadd.f32 %v60_v22, %v59_v21 }
 0x1b6   :  { %87 = vpush %v61_v23 }
 0x1e7   :  { %s88_s1 = spop %87 }
 0x1e8   :  { %s72_s17 = smul.f32 0.125, %s88_s1 }
 0x1ea   :  { %73 = sst [smem:[#allocation3]] %s72_s17 }
 0x1eb   :  { %102 = shalt.err (!%p99_p2)
}
 0x1ec   :  { %s106_s24 = smov [#allocation3]  }
 0x1ed   :  { %81 = dma.smem_to_hbm %s106_s24, 16, %s151_s3, [#allocation4]  }
 0x1ee   :  { %103 = dma.done.wait [#allocation4], 16  }
 0x1ef   :  { %104 = vsyncadd [#allocation4], 4294967280 }
 0x1f0   :  { %85 = sfence }
 0x1f1   :  { %86 = vsyncpa [#allocation4], 1 }

</bundles_post_ra>
